<compile_context>
chip_gen: v7x
topology: tpu7x:2x2x1
jax: 0.10.0
libtpu: 0.0.40
codegen_flags: <defaults>
</compile_context>

<pallas_src>
import jax
import jax.numpy as jnp
from jax import lax
from jax.experimental import pallas as pl
from jax.experimental.pallas import tpu as pltpu


def _vmem_capacity_bytes():
    try:
        return int(pltpu.get_tpu_info().vmem_capacity_bytes)
    except Exception:
        return 64 * 1024 * 1024  # conservative (v7x per-TC figure)


def _tile_plan(B, M, target_bytes):
    """Batch-row tile for the flattened (B, d*d) inputs, sized against VMEM."""
    lane_padded_row_bytes = (-(-M // 128) * 128) * 4  # f32 footprint of one row
    bt = max(1, min(target_bytes // lane_padded_row_bytes, B))
    if bt >= 8:
        bt = (bt // 8) * 8                      # sublane-aligned
    n_chunks = -(-B // bt)
    n_outer = 2 if n_chunks >= 2 else 1         # split for v7x's two TensorCores
    n_inner = -(-n_chunks // n_outer)
    return bt, n_outer, n_inner


def _make_lvgl_kernel(B, bt, M, d, n_inner, needs_mask):
    def kernel(s_ref, th_ref, l_ref, out_ref):
        o = pl.program_id(0)
        i = pl.program_id(1)

        # Output block is resident across the inner (reduction) axis; zero it
        # on the first reduction step of this outer slice.
        @pl.when(i == 0)
        def _():
            out_ref[...] = jnp.zeros_like(out_ref)

        s = s_ref[...].astype(jnp.float32)     # (bt, M) lane-dense
        th = th_ref[...].astype(jnp.float32)
        ll = l_ref[...].astype(jnp.float32)

        # Flat row-major index k of a (d, d) matrix is diagonal iff
        # k % (d + 1) == 0 (k < d*d always holds since M == d*d).
        col = lax.broadcasted_iota(jnp.int32, (bt, M), 1)
        diag = (col % (d + 1)) == 0

        # tr(S @ theta) == sum(S^T ⊙ theta); the wrapper supplies S already
        # symmetric or pre-transposed, so no XLU transpose here.
        tr_prod = s * th
        # Off-diagonal squared Frobenius mass in a single fused pass.
        off_prod = jnp.where(diag, 0.0, th * th)
        l_prod = ll * ll

        if needs_mask:
            # Ragged batch tail: rows past B are out-of-bounds garbage; mask
            # them out of every partial sum.
            row_start = (o * n_inner + i) * bt
            row = lax.broadcasted_iota(jnp.int32, (bt, M), 0) + row_start
            valid = row < B
            tr_prod = jnp.where(valid, tr_prod, 0.0)
            off_prod = jnp.where(valid, off_prod, 0.0)
            l_prod = jnp.where(valid, l_prod, 0.0)

        # Reduce over the batch (sublane) axis only; the lane reduction is
        # deferred to the wrapper.  Partial-sum planes accumulate into the
        # resident output block with plain adds.
        out_ref[:, 0:1, :] += jnp.sum(tr_prod, axis=0).reshape(1, 1, M)
        out_ref[:, 1:2, :] += jnp.sum(off_prod, axis=0).reshape(1, 1, M)
        out_ref[:, 2:3, :] += jnp.sum(l_prod, axis=0).reshape(1, 1, M)

    return kernel


def _lvgl_partial_sums(s_flat, th_flat, l_flat, d):
    """s_flat/th_flat/l_flat: (B, d*d) float.  Returns three f32 scalars:
    sum_b tr(S_b @ theta_b), sum_b ||offdiag(theta_b)||_F^2, sum_b ||L_b||_F^2."""
    B, M = th_flat.shape
    vmem_cap = _vmem_capacity_bytes()
    # ~8 MiB/input on 128 MiB-VMEM chips (v5e/v6e), ~4 MiB/input on v7x.
    target_bytes = max(vmem_cap // 16, 2 * 1024 * 1024)
    # 3 inputs x 2 buffers x target + output + headroom, capped at 3/4 of VMEM.
    vmem_limit = int(min(max(8 * target_bytes, 32 * 1024 * 1024),
                         int(vmem_cap * 0.75)))

    # TODO(synk): for very large d (single flattened row > target), the d*d
    # axis would also need blocking; not needed for loss-sized matrices.
    bt, n_outer, n_inner = _tile_plan(B, M, target_bytes)
    needs_mask = (n_outer * n_inner * bt) != B
    kernel = _make_lvgl_kernel(B, bt, M, d, n_inner, needs_mask)

    in_spec = pl.BlockSpec((bt, M), lambda o, i: (o * n_inner + i, 0))
    grid_spec = pltpu.PrefetchScalarGridSpec(
        num_scalar_prefetch=0,
        grid=(n_outer, n_inner),
        in_specs=[in_spec, in_spec, in_spec],
        out_specs=pl.BlockSpec((1, 3, M), lambda o, i: (o, 0, 0)),
    )
    planes = pl.pallas_call(
        kernel,
        out_shape=jax.ShapeDtypeStruct((n_outer, 3, M), jnp.float32),
        grid_spec=grid_spec,
        compiler_params=pltpu.CompilerParams(
            dimension_semantics=("parallel", "arbitrary"),
            vmem_limit_bytes=vmem_limit,
        ),
    )(s_flat, th_flat, l_flat)

    sums = jnp.sum(planes, axis=(0, 2))  # tiny final lane + outer-core reduce
    return sums[0], sums[1], sums[2]


def latent_variable_graphical_lasso_loss(S, theta, L, alpha, tau, *,
                                          assume_symmetric=True):
    """Forward pass matching the PyTorch module semantics.

    S, theta, L: (B, d, d) float; alpha, tau: scalars.
    assume_symmetric=True uses tr(S@theta)=sum(S*theta) (valid for symmetric
    covariance S, the graphical-lasso setting); set False for general S, in
    which case S is transposed once in the wrapper (extra HBM copy of S only).
    Returns dict of scalar losses.
    """
    B, d, _ = S.shape
    S_eff = S if assume_symmetric else jnp.swapaxes(S, -1, -2)
    M = d * d
    tr_sum, theta_off_sq, l_sq = _lvgl_partial_sums(
        S_eff.reshape(B, M), theta.reshape(B, M), L.reshape(B, M), d)

    # TODO(synk): slogdet (LU factorization) has no clean Pallas equivalent;
    # computed with plain JAX here (theta may be non-SPD, so no Cholesky).
    logdet_sum = jnp.sum(jnp.linalg.slogdet(theta)[1])

    g_log_llh = (tr_sum - logdet_sum) / B
    sparse_term = alpha * jnp.sqrt(theta_off_sq) / B
    low_rank_term = tau * jnp.sqrt(l_sq) / B
    total_loss = g_log_llh + sparse_term + low_rank_term
    return {
        "likelihood": g_log_llh,
        "sparse": sparse_term,
        "low_rank": low_rank_term,
        "total_loss": total_loss,
    }


def _reference(S, theta, L, alpha, tau):
    B, d, _ = S.shape
    Stheta = jnp.trace(jnp.matmul(S, theta), axis1=-2, axis2=-1)
    g_log_llh = jnp.sum(Stheta - jnp.linalg.slogdet(theta)[1]) / B
    mask = 1.0 - jnp.eye(d, dtype=jnp.float32)[None]
    theta_m = mask * theta
    sparse_term = alpha * jnp.linalg.norm(theta_m.reshape(-1)) / B
    low_rank_term = tau * jnp.linalg.norm(L.reshape(-1)) / B
    total = g_log_llh + sparse_term + low_rank_term
    return {
        "likelihood": g_log_llh,
        "sparse": sparse_term,
        "low_rank": low_rank_term,
        "total_loss": total,
    }


if __name__ == "__main__":
    key = jax.random.PRNGKey(0)
    alpha, tau = 0.1, 0.05
    k1, k2, k3, k4, k5, k6 = jax.random.split(key, 6)

    # Test 1: symmetric SPD covariance / precision matrices (the intended
    # graphical-lasso setting), small shapes.
    B, d = 2, 16
    a = jax.random.normal(k1, (B, d, d), dtype=jnp.float32)
    S = jnp.matmul(a, jnp.swapaxes(a, 1, 2)) / d + 0.5 * jnp.eye(d)[None]
    b = jax.random.normal(k2, (B, d, d), dtype=jnp.float32)
    theta = jnp.matmul(b, jnp.swapaxes(b, 1, 2)) / d + 0.5 * jnp.eye(d)[None]
    L = 0.1 * jax.random.normal(k3, (B, d, d), dtype=jnp.float32)

    losses = latent_variable_graphical_lasso_loss(S, theta, L, alpha, tau)
    jax.block_until_ready(losses)
    ref = _reference(S, theta, L, alpha, tau)
    for kname in ("likelihood", "sparse", "low_rank", "total_loss"):
        assert jnp.allclose(losses[kname], ref[kname], rtol=1e-3, atol=1e-3), (
            kname, losses[kname], ref[kname])

    # Test 2: general (non-symmetric) matrices with a ragged batch that
    # exercises the in-kernel tail mask and the 2-way outer split.
    B2, d2 = 37, 16
    S2 = jax.random.normal(k4, (B2, d2, d2), dtype=jnp.float32)
    theta2 = (jax.random.normal(k5, (B2, d2, d2), dtype=jnp.float32)
              + 2.0 * jnp.eye(d2)[None])
    L2 = 0.1 * jax.random.normal(k6, (B2, d2, d2), dtype=jnp.float32)

    losses2 = latent_variable_graphical_lasso_loss(
        S2, theta2, L2, alpha, tau, assume_symmetric=False)
    jax.block_until_ready(losses2)
    ref2 = _reference(S2, theta2, L2, alpha, tau)
    for kname in ("likelihood", "sparse", "low_rank", "total_loss"):
        assert jnp.allclose(losses2[kname], ref2[kname], rtol=1e-3, atol=1e-3), (
            kname, losses2[kname], ref2[kname])

    print("KERNEL_OK")
</pallas_src>

<mosaic_0001>
module attributes {stable_mosaic.version = 11 : i64} {
  func.func @kernel(%arg0: i32, %arg1: i32, %arg2: memref<2x256xf32, #tpu.memory_space<vmem>>, %arg3: memref<2x256xf32, #tpu.memory_space<vmem>>, %arg4: memref<2x256xf32, #tpu.memory_space<vmem>>, %arg5: memref<1x3x256xf32, #tpu.memory_space<vmem>>) attributes {dimension_semantics = [#tpu.dimension_semantics<parallel>, #tpu.dimension_semantics<arbitrary>], iteration_bounds = array<i64: 1, 1>, scalar_prefetch = 0 : i64, scratch_operands = 0 : i64, tpu.core_type = #tpu.core_type<tc>, window_params = [{transform_indices = @transform_0, window_bounds = array<i64: 2, 256>}, {transform_indices = @transform_1, window_bounds = array<i64: 2, 256>}, {transform_indices = @transform_2, window_bounds = array<i64: 2, 256>}, {transform_indices = @transform_3, window_bounds = array<i64: 1, 3, 256>}]} {
    %c0_i32 = arith.constant 0 : i32
    %0 = arith.cmpi eq, %arg1, %c0_i32 : i32
    %1 = arith.extui %0 : i1 to i32
    %c0_i32_0 = arith.constant 0 : i32
    %2 = arith.cmpi ne, %1, %c0_i32_0 : i32
    scf.if %2 {
      %cst_30 = arith.constant 0.000000e+00 : f32
      %45 = vector.broadcast %cst_30 : f32 to vector<1x3x256xf32>
      %c0_31 = arith.constant 0 : index
      %c0_32 = arith.constant 0 : index
      %c0_33 = arith.constant 0 : index
      %46 = vector.load %arg5[%c0_31, %c0_32, %c0_33] : memref<1x3x256xf32, #tpu.memory_space<vmem>>, vector<1x3x256xf32>
      tpu.vector_store %arg5[%c0_31, %c0_32, %c0_33], %45 {strides = array<i32>} : memref<1x3x256xf32, #tpu.memory_space<vmem>>, vector<1x3x256xf32>,
    } else {
    }
    %c0 = arith.constant 0 : index
    %c0_1 = arith.constant 0 : index
    %3 = vector.load %arg2[%c0, %c0_1] : memref<2x256xf32, #tpu.memory_space<vmem>>, vector<2x256xf32>
    %c0_2 = arith.constant 0 : index
    %c0_3 = arith.constant 0 : index
    %4 = vector.load %arg3[%c0_2, %c0_3] : memref<2x256xf32, #tpu.memory_space<vmem>>, vector<2x256xf32>
    %c0_4 = arith.constant 0 : index
    %c0_5 = arith.constant 0 : index
    %5 = vector.load %arg4[%c0_4, %c0_5] : memref<2x256xf32, #tpu.memory_space<vmem>>, vector<2x256xf32>
    %6 = tpu.iota {dimensions = array<i32: 1>} : vector<2x256xi32>
    %c17_i32 = arith.constant 17 : i32
    %c0_i32_6 = arith.constant 0 : i32
    %7 = arith.cmpi eq, %c17_i32, %c0_i32_6 : i32
    %c1_i32 = arith.constant 1 : i32
    %8 = arith.select %7, %c1_i32, %c17_i32 : i32
    %9 = vector.broadcast %8 : i32 to vector<2x256xi32>
    %10 = arith.remsi %6, %9 : vector<2x256xi32>
    %c0_i32_7 = arith.constant 0 : i32
    %11 = vector.broadcast %c0_i32_7 : i32 to vector<2x256xi32>
    %12 = arith.cmpi ne, %10, %11 : vector<2x256xi32>
    %c0_i32_8 = arith.constant 0 : i32
    %13 = vector.broadcast %c0_i32_8 : i32 to vector<2x256xi32>
    %14 = arith.cmpi slt, %10, %13 : vector<2x256xi32>
    %c0_i32_9 = arith.constant 0 : i32
    %15 = arith.cmpi slt, %8, %c0_i32_9 : i32
    %16 = vector.broadcast %15 : i1 to vector<2x256xi1>
    %17 = vector.broadcast %16 : vector<2x256xi1> to vector<2x256xi1>
    %18 = arith.xori %14, %17 : vector<2x256xi1>
    %19 = arith.andi %18, %12 : vector<2x256xi1>
    %20 = vector.broadcast %8 : i32 to vector<2x256xi32>
    %21 = arith.addi %10, %20 : vector<2x256xi32>
    %22 = arith.select %19, %21, %10 : vector<2x256xi1>, vector<2x256xi32>
    %c0_i32_10 = arith.constant 0 : i32
    %23 = vector.broadcast %c0_i32_10 : i32 to vector<2x256xi32>
    %24 = arith.cmpi eq, %22, %23 : vector<2x256xi32>
    %25 = arith.mulf %3, %4 : vector<2x256xf32>
    %26 = arith.mulf %4, %4 : vector<2x256xf32>
    %cst = arith.constant 0.000000e+00 : f32
    %27 = vector.broadcast %cst : f32 to vector<2x256xf32>
    %28 = arith.select %24, %27, %26 : vector<2x256xi1>, vector<2x256xf32>
    %29 = arith.mulf %5, %5 : vector<2x256xf32>
    %c0_11 = arith.constant 0 : index
    %c0_12 = arith.constant 0 : index
    %c0_13 = arith.constant 0 : index
    %30 = vector.load %arg5[%c0_11, %c0_12, %c0_13] : memref<1x3x256xf32, #tpu.memory_space<vmem>>, vector<1x1x256xf32>
    %cst_14 = arith.constant dense<0.000000e+00> : vector<256xf32>
    %31 = vector.multi_reduction <add>, %25, %cst_14 [0] : vector<2x256xf32> to vector<256xf32>
    %32 = vector.shape_cast %31 : vector<256xf32> to vector<1x1x256xf32>
    %33 = arith.addf %30, %32 : vector<1x1x256xf32>
    %c0_15 = arith.constant 0 : index
    %c0_16 = arith.constant 0 : index
    %c0_17 = arith.constant 0 : index
    %34 = vector.load %arg5[%c0_15, %c0_16, %c0_17] : memref<1x3x256xf32, #tpu.memory_space<vmem>>, vector<1x1x256xf32>
    tpu.vector_store %arg5[%c0_15, %c0_16, %c0_17], %33 {strides = array<i32>} : memref<1x3x256xf32, #tpu.memory_space<vmem>>, vector<1x1x256xf32>,
    %c0_18 = arith.constant 0 : index
    %c1 = arith.constant 1 : index
    %c0_19 = arith.constant 0 : index
    %35 = vector.load %arg5[%c0_18, %c1, %c0_19] : memref<1x3x256xf32, #tpu.memory_space<vmem>>, vector<1x1x256xf32>
    %cst_20 = arith.constant dense<0.000000e+00> : vector<256xf32>
    %36 = vector.multi_reduction <add>, %28, %cst_20 [0] : vector<2x256xf32> to vector<256xf32>
    %37 = vector.shape_cast %36 : vector<256xf32> to vector<1x1x256xf32>
    %38 = arith.addf %35, %37 : vector<1x1x256xf32>
    %c0_21 = arith.constant 0 : index
    %c1_22 = arith.constant 1 : index
    %c0_23 = arith.constant 0 : index
    %39 = vector.load %arg5[%c0_21, %c1_22, %c0_23] : memref<1x3x256xf32, #tpu.memory_space<vmem>>, vector<1x1x256xf32>
    tpu.vector_store %arg5[%c0_21, %c1_22, %c0_23], %38 {strides = array<i32>} : memref<1x3x256xf32, #tpu.memory_space<vmem>>, vector<1x1x256xf32>,
    %c0_24 = arith.constant 0 : index
    %c2 = arith.constant 2 : index
    %c0_25 = arith.constant 0 : index
    %40 = vector.load %arg5[%c0_24, %c2, %c0_25] : memref<1x3x256xf32, #tpu.memory_space<vmem>>, vector<1x1x256xf32>
    %cst_26 = arith.constant dense<0.000000e+00> : vector<256xf32>
    %41 = vector.multi_reduction <add>, %29, %cst_26 [0] : vector<2x256xf32> to vector<256xf32>
    %42 = vector.shape_cast %41 : vector<256xf32> to vector<1x1x256xf32>
    %43 = arith.addf %40, %42 : vector<1x1x256xf32>
    %c0_27 = arith.constant 0 : index
    %c2_28 = arith.constant 2 : index
    %c0_29 = arith.constant 0 : index
    %44 = vector.load %arg5[%c0_27, %c2_28, %c0_29] : memref<1x3x256xf32, #tpu.memory_space<vmem>>, vector<1x1x256xf32>
    tpu.vector_store %arg5[%c0_27, %c2_28, %c0_29], %43 {strides = array<i32>} : memref<1x3x256xf32, #tpu.memory_space<vmem>>, vector<1x1x256xf32>,
    return
  }
  func.func @transform_0(%arg0: i32, %arg1: i32) -> (i32, i32) {
    %c1_i32 = arith.constant 1 : i32
    %0 = arith.muli %arg0, %c1_i32 : i32
    %1 = arith.addi %0, %arg1 : i32
    %c0_i32 = arith.constant 0 : i32
    %c0_i32_0 = arith.constant 0 : i32
    return %1, %c0_i32 : i32, i32
  }
  func.func @transform_1(%arg0: i32, %arg1: i32) -> (i32, i32) {
    %c1_i32 = arith.constant 1 : i32
    %0 = arith.muli %arg0, %c1_i32 : i32
    %1 = arith.addi %0, %arg1 : i32
    %c0_i32 = arith.constant 0 : i32
    %c0_i32_0 = arith.constant 0 : i32
    return %1, %c0_i32 : i32, i32
  }
  func.func @transform_2(%arg0: i32, %arg1: i32) -> (i32, i32) {
    %c1_i32 = arith.constant 1 : i32
    %0 = arith.muli %arg0, %c1_i32 : i32
    %1 = arith.addi %0, %arg1 : i32
    %c0_i32 = arith.constant 0 : i32
    %c0_i32_0 = arith.constant 0 : i32
    return %1, %c0_i32 : i32, i32
  }
  func.func @transform_3(%arg0: i32, %arg1: i32) -> (i32, i32, i32) {
    %c0_i32 = arith.constant 0 : i32
    %c0_i32_0 = arith.constant 0 : i32
    %c0_i32_1 = arith.constant 0 : i32
    return %arg0, %c0_i32, %c0_i32_0 : i32, i32, i32
  }
}

</mosaic_0001>

<bundles_post_ra>
// kernel: tpu_custom_call.1
= control target key start
LH: loop header
LB: loop body
LE: loop exit
PB: predicated region body
PF: predicated region fallthrough
CT: control target
= control target key end

     0   :  { %8 = vsyncpa [#allocation3], 0  ;;  %s430_s0 = inlined_call_operand.hbm [shape: f32[2,256], index: 0, kind: input, shape index: {}]   ;;  %s431_s1 = inlined_call_operand.hbm [shape: f32[2,256], index: 1, kind: input, shape index: {}]   ;;  %s432_s2 = inlined_call_operand.vmem [shape: f32[2,256], index: 2, kind: input, shape index: {}]   ;;  %s433_s3 = inlined_call_operand.vmem [shape: f32[1,3,256], index: 3, kind: output, shape index: {}]  }
   0x1   :  { %9 = vsyncpa [#allocation5], 0  ;;  %s336_s12 = smov [#allocation2]   ;;  %s337_s14 = smov [#allocation4]  }
   0x2   :  { %s20_s13 = sshll.u32 %s336_s12, 4  ;;  %s34_s15 = sshll.u32 %s337_s14, 4  ;;  %s21_s13 = int_to_ptr.vmem [resolvable:$true] %s20_s13  ;;  %s35_s15 = int_to_ptr.vmem [resolvable:$true] %s34_s15 }
   0x3   :  { %s288_s18 = scalar_lea.hbm %s430_s0, 64 }
   0x4   :  { %p289_p0 = scmp.ne.s32.totalorder %s430_s0, %s288_s18  ;;  %p292_p1 = scmp.lt.u32.totalorder %s288_s18, %s430_s0 }
   0x6   :  { %p294_p2 = pnand %p292_p1, %p289_p0 }
   0x8   :  { %297 = shalt.err (!%p294_p2)
}
   0x9   :  { %s298_s23 = scalar_lea.vmem %s21_s13, 64  ;;  %p303_p4 = scmp.lt.s32.totalorder %s21_s13, %s21_s13 }
   0xa   :  { %p299_p3 = scmp.ne.s32.totalorder %s21_s13, %s298_s23  ;;  %p304_p5 = scmp.lt.s32.totalorder %s298_s23, %s298_s23 }
   0xc   :  { %p305_p6 = por %p304_p5, %p303_p4 }
   0xe   :  { %p306_p7 = pnand %p305_p6, %p299_p3 }
  0x10   :  { %309 = shalt.err (!%p306_p7)
}
  0x11   :  { %23 = dma.hbm_to_vmem [thread:$0]  %s430_s0, 64, %s21_s13, [#allocation3]  }
  0x12   :  { %s310_s28 = scalar_lea.hbm %s431_s1, 64 }
  0x13   :  { %p311_p8 = scmp.ne.s32.totalorder %s431_s1, %s310_s28  ;;  %p314_p9 = scmp.lt.u32.totalorder %s310_s28, %s431_s1 }
  0x15   :  { %p316_p10 = pnand %p314_p9, %p311_p8 }
  0x17   :  { %319 = shalt.err (!%p316_p10)
}
  0x18   :  { %s320_s6 = scalar_lea.vmem %s35_s15, 64  ;;  %p325_p12 = scmp.lt.s32.totalorder %s35_s15, %s35_s15 }
  0x19   :  { %p321_p11 = scmp.ne.s32.totalorder %s35_s15, %s320_s6  ;;  %p326_p13 = scmp.lt.s32.totalorder %s320_s6, %s320_s6 }
  0x1b   :  { %p327_p0 = por %p326_p13, %p325_p12 }
  0x1d   :  { %p328_p1 = pnand %p327_p0, %p321_p11 }
  0x1f   :  { %331 = shalt.err (!%p328_p1)
}
  0x20   :  { %37 = dma.hbm_to_vmem [thread:$0]  %s431_s1, 64, %s35_s15, [#allocation5]  }
  0x21   :  { %332 = dma.done.wait [#allocation3], 64  }
  0x22   :  { %333 = vsyncadd [#allocation3], 4294967232 }
  0x23   :  { %334 = dma.done.wait [#allocation5], 64  }
  0x24   :  { %335 = vsyncadd [#allocation5], 4294967232  ;;  %v76_v0 = vlaneseq  ;;  %v338_v1 = vmov 0.0   ;;  %v339_v2 = vmov 1983009808   ;;  %vm141_vm0 = vcmask 1041408  }
  0x25   :  { %72 = vst [vmem:[%s433_s3] sm:$0x77] %v338_v1  ;;  %v117_v3 = vunpack.c.l.s4 %v339_v2  ;;  %v73_v13 = vld [vmem:[#allocation2] sm:$0xf]  ;;  %v74_v14 = vld [vmem:[#allocation4] sm:$0xf] }
  0x26   :  { %v77_v4 = vand.u32 127, %v76_v0  ;;  %v390_v5 = vshrl.u32 %v76_v0, 7  ;;  %v75_v15 = vld [vmem:[%s432_s2] sm:$0xf]  ;;  %v113_v17 = vmul.f32 %v74_v14, %v73_v13  ;;  %v114_v18 = vmul.f32 %v74_v14, %v74_v14 }
  0x27   :  { %v118_v6 = vunpack.c.0.s8 %v117_v3  ;;  %v128_v19 = vmul.f32 %v75_v15, %v75_v15  ;;  %v340_v24 = vmov 1966171168   ;;  %vm177_vm9 = vcmp.lt.s32.totalorder %v76_v0, 256 }
  0x28   :  { %v78_v7 = vadd.s32 128, %v77_v4  ;;  %v392_v8 = vmul.u32.u64.low 4042322161, %v77_v4  ;;  %v393_v9 = vmul.u32.u64.high 4042322161, %v77_v4, %v392_v8  ;;  %v160_v25 = vunpack.c.l.s4 %v340_v24 }
  0x29   :  { %v121_v12 = vsub.s32 %v118_v6, %v390_v5 }
  0x2a   :  { %v395_v10 = vmul.u32.u64.low 4042322161, %v78_v7  ;;  %v396_v11 = vmul.u32.u64.high 4042322161, %v78_v7, %v395_v10  ;;  %v85_v16 = vshrl.u32 %v393_v9, 4  ;;  %v161_v47 = vunpack.c.0.s8 %v160_v25 }
  0x2b   :  { %v122_v22 = vrot.slane %v114_v18, %v121_v12  ;;  %v137_v23 = vrot.slane %v113_v17, %v121_v12  ;;  %v225_v26 = vrot.slane %v128_v19, %v121_v12 }
  0x2c   :  { %v86_v20 = vmul.u32 17, %v85_v16  ;;  %v96_v21 = vshrl.u32 %v396_v11, 4  ;;  %v164_v9 = vsub.s32 %v161_v47, %v390_v5 }
  0x2d   :  { %v138_v29 = vcombine.high %v137_v23, %v137_v23  ;;  %v142_v30 = vsel %vm141_vm0, %v137_v23, 0.0  ;;  %v123_v32 = vcombine.high %v122_v22, %v122_v22  ;;  %v226_v33 = vcombine.high %v225_v26, %v225_v26 }
  0x2e   :  { %v87_v27 = vsub.s32 %v77_v4, %v86_v20  ;;  %v97_v28 = vmul.u32 17, %v96_v21  ;;  %v143_v31 = vrot.slane %v142_v30, 4  ;;  %v229_v34 = vsel %vm141_vm0, %v225_v26, 0.0  ;;  %v129_v20 = vld [vmem:[%s433_s3] ss:$4 sm:$0x3] }
  0x2f   :  { %v149_v36 = vsel %vm141_vm0, %v138_v29, 0.0  ;;  %v230_v40 = vrot.slane %v229_v34, 4  ;;  %v236_v42 = vsel %vm141_vm0, %v226_v33, 0.0 }
  0x30   :  { %v98_v35 = vsub.s32 %v78_v7, %v97_v28  ;;  %vm101_vm1 = vcmp.ne.s32.totalorder %v87_v27, 0  ;;  %vm103_vm2 = vcmp.lt.s32.totalorder %v87_v27, 0  ;;  %v144_v37 = vadd.f32 %v143_v31, %v142_v30 }
  0x31   :  { %v150_v38 = vrot.slane %v149_v36, 4  ;;  %vm105_vm3 = vmand %vm103_vm2, %vm101_vm1  ;;  %v107_v39 = vadd.s32 17, %v87_v27  ;;  %v231_v46 = vadd.f32 %v230_v40, %v229_v34  ;;  %v237_v49 = vrot.slane %v236_v42, 4 }
  0x32   :  { %vm102_vm4 = vcmp.ne.s32.totalorder %v98_v35, 0  ;;  %vm104_vm5 = vcmp.lt.s32.totalorder %v98_v35, 0  ;;  %v108_v41 = vadd.s32 17, %v98_v35  ;;  %v145_v43 = vrot.slane %v144_v37, 2 }
  0x33   :  { %v151_v44 = vadd.f32 %v150_v38, %v149_v36  ;;  %vm106_vm6 = vmand %vm104_vm5, %vm102_vm4  ;;  %v109_v45 = vsel %vm105_vm3, %v107_v39, %v87_v27  ;;  %v232_v55 = vrot.slane %v231_v46, 2  ;;  %v238_v56 = vadd.f32 %v237_v49, %v236_v42  ;;  %v277_v27 = vld [vmem:[%s433_s3 + $0x2] ss:$4 sm:$0x3] }
  0x34   :  { %v110_v48 = vsel %vm106_vm6, %v108_v41, %v98_v35  ;;  %vm111_vm7 = vcmp.eq.s32.totalorder %v109_v45, 0  ;;  %v146_v50 = vadd.f32 %v145_v43, %v144_v37 }
  0x35   :  { %v152_v51 = vrot.slane %v151_v44, 2  ;;  %vm112_vm8 = vcmp.eq.s32.totalorder %v110_v48, 0  ;;  %v126_v52 = vsel %vm111_vm7, 0.0, %v122_v22  ;;  %v233_v62 = vadd.f32 %v232_v55, %v231_v46 }
  0x36   :  { %v127_v53 = vsel %vm112_vm8, 0.0, %v123_v32  ;;  %v182_v54 = vsel %vm141_vm0, %v126_v52, 0.0  ;;  %v147_v57 = vrot.slane %v146_v50, 1  ;;  %v239_v63 = vrot.slane %v238_v56, 2 }
  0x37   :  { %v153_v58 = vadd.f32 %v152_v51, %v151_v44  ;;  %v183_v59 = vrot.slane %v182_v54, 4  ;;  %v189_v60 = vsel %vm141_vm0, %v127_v53, 0.0  ;;  %v234_v6 = vrot.slane %v233_v62, 1  ;;  %v275_v32 = vld [vmem:[%s433_s3 + $0x1] ss:$4 sm:$0x3] }
  0x38   :  { %v190_v61 = vrot.slane %v189_v60, 4  ;;  %v148_v1 = vadd.f32 %v147_v57, %v146_v50  ;;  %v240_v7 = vadd.f32 %v239_v63, %v238_v56 }
  0x39   :  { %v154_v2 = vrot.slane %v153_v58, 1  ;;  %v184_v3 = vadd.f32 %v183_v59, %v182_v54  ;;  %v235_v12 = vadd.f32 %v234_v6, %v233_v62 }
  0x3a   :  { %v191_v4 = vadd.f32 %v190_v61, %v189_v60  ;;  %v241_v13 = vrot.slane %v240_v7, 1 }
  0x3b   :  { %v155_v8 = vadd.f32 %v154_v2, %v153_v58  ;;  %v185_v10 = vrot.slane %v184_v3, 2 }
  0x3c   :  { %v192_v11 = vrot.slane %v191_v4, 2  ;;  %v242_v17 = vadd.f32 %v241_v13, %v240_v7 }
  0x3d   :  { %v158_v14 = vcombine.low %v148_v1, %v155_v8  ;;  %v186_v15 = vadd.f32 %v185_v10, %v184_v3 }
  0x3e   :  { %v193_v16 = vadd.f32 %v192_v11, %v191_v4  ;;  %v245_v22 = vcombine.low %v235_v12, %v242_v17 }
  0x3f   :  { %v165_v18 = vrot.slane %v158_v14, %v164_v9  ;;  %v187_v19 = vrot.slane %v186_v15, 1 }
  0x40   :  { %v194_v21 = vrot.slane %v193_v16, 1  ;;  %v252_v25 = vrot.slane %v245_v22, %v164_v9 }
  0x41   :  { %v172_v23 = vrot.slane %v165_v18, %v164_v9  ;;  %v188_v24 = vadd.f32 %v187_v19, %v186_v15 }
  0x42   :  { %v195_v5 = vadd.f32 %v194_v21, %v193_v16  ;;  %v259_v29 = vrot.slane %v252_v25, %v164_v9 }
  0x43   :  { %v174_v26 = vadd.f32 %v172_v23, %v129_v20 }
  0x44   :  { %v198_v28 = vcombine.low %v188_v24, %v195_v5  ;;  %v261_v31 = vadd.f32 %v277_v27, %v259_v29 }
  0x45   :  { %179 = vst.msk [vmem:[%s433_s3] ss:$4 sm:$0x3] %vm177_vm9, %v174_v26 }
  0x46   :  { %v205_v30 = vrot.slane %v198_v28, %v164_v9  ;;  %278 = vst.msk [vmem:[%s433_s3 + $0x2] ss:$4 sm:$0x3] %vm177_vm9, %v261_v31 }
  0x48   :  { %v212_v0 = vrot.slane %v205_v30, %v164_v9 }
  0x4a   :  { %v214_v33 = vadd.f32 %v275_v32, %v212_v0 }
  0x4c   :  { %276 = vst.msk [vmem:[%s433_s3 + $0x1] ss:$4 sm:$0x3] %vm177_vm9, %v214_v33 }
  0x4d   :  { %267 = vsyncpa [#allocation3], 1 }
  0x4e   :  { %268 = vsyncpa [#allocation5], 1 }

</bundles_post_ra>
